<compile_context>
chip_gen: v5e
topology: v5e:2x2
jax: 0.10.0
libtpu: 0.0.40
codegen_flags: <defaults>
</compile_context>

<pallas_src>
import functools

import jax
import jax.numpy as jnp
from jax.experimental import pallas as pl
from jax.experimental.pallas import tpu as pltpu


def _softplus(x):
    # torch.nn.functional.softplus (beta=1, threshold=20), overflow-free:
    #   x <= 20 : max(x, 0) + log(1 + exp(-|x|))   (== log1p(exp(x)))
    #   x  > 20 : x
    stable = jnp.maximum(x, 0.0) + jnp.log(1.0 + jnp.exp(-jnp.abs(x)))
    return jnp.where(x > 20.0, x, stable)


def _softclip(t, mini):
    return mini + _softplus(t - mini)


def _vloss_kernel(x_ref, lv_ref, out_ref, acc_ref, *, D, block_rows,
                  rows_total, inv_n, needs_mask):
    """One (block_rows, 2D) slab of the fused KLD reduction.

    x_ref / lv_ref hold [mu0 | mu1] and [lv0 | lv1] side by side along the
    lane axis.  acc_ref is a per-core (block_rows, D) f32 accumulator carried
    across the inner ("arbitrary") grid axis; the per-core partial (already
    scaled by 1/(B*D)) is broadcast into the (1, 8, 128) output block at the
    last inner step.
    """
    p = pl.program_id(0)          # parallel axis (v7x dual-TC split)
    i = pl.program_id(1)          # reduction axis
    nsteps = pl.num_programs(1)

    @pl.when(i == 0)
    def _init():
        acc_ref[...] = jnp.zeros_like(acc_ref)

    x = x_ref[...].astype(jnp.float32)    # (block_rows, 2D)
    lv = lv_ref[...].astype(jnp.float32)  # (block_rows, 2D)

    mu0 = x[:, :D]
    mu1 = x[:, D:]
    lv0 = lv[:, :D]
    lv1 = lv[:, D:]

    s2p = jnp.exp(lv0)        # sigma_p^2
    s2q = jnp.exp(lv1)        # sigma_q^2
    inv_s2p = jnp.exp(-lv0)   # exact 1/sigma_p^2 (replaces the divide)

    dmu = mu0 - mu1
    # First KLD term; log(exp(lv/2)) simplified to lv/2.
    term1 = -(
        _softclip(0.5 * lv1, -6.0)
        - _softclip(0.5 * lv0, -6.0)
        - (s2q + dmu * dmu) * (0.5 * inv_s2p)
        + 0.5
    )
    # Second KLD term, -0.5 * mean(1 + logVar - mu^2 - exp(logVar)), folded
    # per-(b,d) pair and reusing s2p/s2q (no extra exp over (B,2,D)).
    term2 = -0.25 * (2.0 + lv0 + lv1 - mu0 * mu0 - mu1 * mu1 - s2p - s2q)
    contrib = term1 + term2   # (block_rows, D)

    if needs_mask:
        # Ragged tail: zero contributions from padded / out-of-range rows.
        offset = (p * nsteps + i) * block_rows
        valid = rows_total - offset            # may be <= 0 for the tail point
        row_idx = jax.lax.broadcasted_iota(jnp.int32, contrib.shape, 0)
        contrib = jnp.where(row_idx < valid, contrib, 0.0)

    # Pure VPU add; no per-step cross-lane reduce.
    acc_ref[...] = acc_ref[...] + contrib

    @pl.when(i == nsteps - 1)
    def _finalize():
        out_ref[...] = jnp.zeros_like(out_ref) + jnp.sum(acc_ref[...]) * inv_n


def vloss_pallas(mu, logVar, *, max_block_rows=2048):
    B, two, D = mu.shape
    assert two == 2 and logVar.shape == (B, 2, D)
    n = B * D
    width = 2 * D

    # Free contiguous reshapes (bitcasts) — no HBM copies are materialized.
    mu2 = mu.reshape(B, width)
    lv2 = logVar.reshape(B, width)

    sublane = 16 if mu.dtype == jnp.bfloat16 else 8
    # VMEM budget per step: 2 inputs x 2 buffers x block_rows*2D*4B
    #                       + acc block_rows*D*4B  ~= 36 * block_rows * D bytes.
    # block_rows*D <= 262144  =>  ~9.4 MiB, safe under v5e's 16 MiB scoped VMEM.
    target_pair_elems = 262144
    cand = (target_pair_elems // max(D, 1)) // sublane * sublane
    cand = max(sublane, min(max_block_rows, cand))
    block_rows = B if B <= cand else cand

    total_blocks = pl.cdiv(B, block_rows)
    par = 2 if total_blocks >= 2 else 1          # split reduction over v7x's 2 TCs
    inner = pl.cdiv(total_blocks, par)
    max_blk = total_blocks - 1

    def in_map(p, i):
        blk = p * inner + i
        # Clamp so a redundant tail grid point never addresses past the last
        # valid block; its contribution is masked to zero in the kernel.
        return (jnp.minimum(blk, max_blk), 0)

    in_spec = pl.BlockSpec((block_rows, width), in_map)
    out_spec = pl.BlockSpec((1, 8, 128), lambda p, i: (p, 0, 0))

    needs_mask = (B % block_rows != 0) or (par * inner != total_blocks)

    kernel = functools.partial(
        _vloss_kernel, D=D, block_rows=block_rows, rows_total=B,
        inv_n=1.0 / n, needs_mask=needs_mask)

    out = pl.pallas_call(
        kernel,
        out_shape=jax.ShapeDtypeStruct((par, 8, 128), jnp.float32),
        grid=(par, inner),
        in_specs=[in_spec, in_spec],
        out_specs=out_spec,
        scratch_shapes=[pltpu.VMEM((block_rows, D), jnp.float32)],
        compiler_params=pltpu.CompilerParams(
            dimension_semantics=("parallel", "arbitrary")),
    )(mu2, lv2)
    # Each parallel slice wrote its (already 1/(B*D)-scaled) partial into its
    # output block; add the partials here (tiny XLA op).
    return jnp.sum(out[:, 0, 0])


def vloss_ref(mu, logVar):
    # Pure-JAX mirror of the PyTorch forward, for correctness checking.
    mu = mu.astype(jnp.float32)
    lv = logVar.astype(jnp.float32)
    sc = lambda t: -6.0 + jax.nn.softplus(t + 6.0)
    s2q = jnp.exp(lv[:, 1, :])
    s2p = jnp.exp(lv[:, 0, :])
    sq = jnp.exp(lv[:, 1, :] / 2)
    sp = jnp.exp(lv[:, 0, :] / 2)
    kld = -jnp.mean(
        sc(jnp.log(sq)) - sc(jnp.log(sp))
        - (s2q + (mu[:, 0, :] - mu[:, 1, :]) ** 2) / (2 * s2p) + 0.5
    )
    kld += -0.5 * jnp.mean(1 + lv - mu**2 - jnp.exp(lv))
    return kld


if __name__ == "__main__":
    key = jax.random.PRNGKey(0)
    k1, k2, k3, k4 = jax.random.split(key, 4)

    # Small shape matching the module's [B, 2, D] layout (single block,
    # exercises the lane-offset slicing path with D % 128 != 0).
    B, D = 2, 32
    mu_s = jax.random.normal(k1, (B, 2, D), dtype=jnp.float32)
    lv_s = 0.5 * jax.random.normal(k2, (B, 2, D), dtype=jnp.float32)
    out_s = vloss_pallas(mu_s, lv_s)
    jax.block_until_ready(out_s)
    ref_s = vloss_ref(mu_s, lv_s)
    assert jnp.allclose(out_s, ref_s, rtol=3e-5, atol=3e-5), (out_s, ref_s)

    # Larger shape exercising the tiled reduction grid, the two "parallel"
    # reduction slices, the clamped redundant tail grid point and the
    # in-kernel ragged-row mask (100 rows, 16-row blocks -> 7 blocks).
    B2, D2 = 100, 128
    mu_l = jax.random.normal(k3, (B2, 2, D2), dtype=jnp.float32)
    lv_l = 0.5 * jax.random.normal(k4, (B2, 2, D2), dtype=jnp.float32)
    out_l = vloss_pallas(mu_l, lv_l, max_block_rows=16)
    jax.block_until_ready(out_l)
    ref_l = vloss_ref(mu_l, lv_l)
    assert jnp.allclose(out_l, ref_l, rtol=3e-5, atol=3e-5), (out_l, ref_l)

    print("KERNEL_OK")
</pallas_src>

<mosaic_0001>
module attributes {stable_mosaic.version = 11 : i64} {
  func.func @_vloss_kernel(%arg0: i32, %arg1: i32, %arg2: memref<2x64xf32, #tpu.memory_space<vmem>>, %arg3: memref<2x64xf32, #tpu.memory_space<vmem>>, %arg4: memref<1x8x128xf32, #tpu.memory_space<vmem>>, %arg5: memref<2x32xf32, #tpu.memory_space<vmem>>) attributes {dimension_semantics = [#tpu.dimension_semantics<parallel>, #tpu.dimension_semantics<arbitrary>], iteration_bounds = array<i64: 1, 1>, scalar_prefetch = 0 : i64, scratch_operands = 1 : i64, tpu.core_type = #tpu.core_type<tc>, window_params = [{transform_indices = @transform_0, window_bounds = array<i64: 2, 64>}, {transform_indices = @transform_1, window_bounds = array<i64: 2, 64>}, {transform_indices = @transform_2, window_bounds = array<i64: 1, 8, 128>}]} {
    %c0_i32 = arith.constant 0 : i32
    %0 = arith.cmpi eq, %arg1, %c0_i32 : i32
    %1 = arith.extui %0 : i1 to i32
    %c0_i32_0 = arith.constant 0 : i32
    %2 = arith.cmpi ne, %1, %c0_i32_0 : i32
    scf.if %2 {
      %cst_29 = arith.constant 0.000000e+00 : f32
      %82 = vector.broadcast %cst_29 : f32 to vector<2x32xf32>
      %c0_30 = arith.constant 0 : index
      %c0_31 = arith.constant 0 : index
      %83 = vector.load %arg5[%c0_30, %c0_31] : memref<2x32xf32, #tpu.memory_space<vmem>>, vector<2x32xf32>
      tpu.vector_store %arg5[%c0_30, %c0_31], %82 {strides = array<i32>} : memref<2x32xf32, #tpu.memory_space<vmem>>, vector<2x32xf32>,
    } else {
    }
    %c0 = arith.constant 0 : index
    %c0_1 = arith.constant 0 : index
    %3 = vector.load %arg2[%c0, %c0_1] : memref<2x64xf32, #tpu.memory_space<vmem>>, vector<2x64xf32>
    %c0_2 = arith.constant 0 : index
    %c0_3 = arith.constant 0 : index
    %4 = vector.load %arg3[%c0_2, %c0_3] : memref<2x64xf32, #tpu.memory_space<vmem>>, vector<2x64xf32>
    %5 = vector.extract_strided_slice %3 {offsets = [0, 0], sizes = [2, 32], strides = [1, 1]} : vector<2x64xf32> to vector<2x32xf32>
    %6 = vector.extract_strided_slice %3 {offsets = [0, 32], sizes = [2, 32], strides = [1, 1]} : vector<2x64xf32> to vector<2x32xf32>
    %7 = vector.extract_strided_slice %4 {offsets = [0, 0], sizes = [2, 32], strides = [1, 1]} : vector<2x64xf32> to vector<2x32xf32>
    %8 = vector.extract_strided_slice %4 {offsets = [0, 32], sizes = [2, 32], strides = [1, 1]} : vector<2x64xf32> to vector<2x32xf32>
    %9 = math.exp %7 : vector<2x32xf32>
    %10 = math.exp %8 : vector<2x32xf32>
    %cst = arith.constant 0.000000e+00 : f32
    %11 = vector.broadcast %cst : f32 to vector<2x32xf32>
    %12 = arith.subf %11, %7 : vector<2x32xf32>
    %13 = math.exp %12 : vector<2x32xf32>
    %14 = arith.subf %5, %6 : vector<2x32xf32>
    %cst_4 = arith.constant 5.000000e-01 : f32
    %15 = vector.broadcast %cst_4 : f32 to vector<2x32xf32>
    %16 = arith.mulf %15, %8 : vector<2x32xf32>
    %cst_5 = arith.constant -6.000000e+00 : f32
    %17 = vector.broadcast %cst_5 : f32 to vector<2x32xf32>
    %18 = arith.subf %16, %17 : vector<2x32xf32>
    %cst_6 = arith.constant 0.000000e+00 : f32
    %19 = vector.broadcast %cst_6 : f32 to vector<2x32xf32>
    %20 = arith.maximumf %18, %19 : vector<2x32xf32>
    %21 = math.absf %18 : vector<2x32xf32>
    %cst_7 = arith.constant 0.000000e+00 : f32
    %22 = vector.broadcast %cst_7 : f32 to vector<2x32xf32>
    %23 = arith.subf %22, %21 : vector<2x32xf32>
    %24 = math.exp %23 : vector<2x32xf32>
    %cst_8 = arith.constant 1.000000e+00 : f32
    %25 = vector.broadcast %cst_8 : f32 to vector<2x32xf32>
    %26 = arith.addf %25, %24 : vector<2x32xf32>
    %27 = math.log %26 : vector<2x32xf32>
    %28 = arith.addf %20, %27 : vector<2x32xf32>
    %cst_9 = arith.constant 2.000000e+01 : f32
    %29 = vector.broadcast %cst_9 : f32 to vector<2x32xf32>
    %30 = arith.cmpf ogt, %18, %29 : vector<2x32xf32>
    %31 = arith.select %30, %18, %28 : vector<2x32xi1>, vector<2x32xf32>
    %cst_10 = arith.constant -6.000000e+00 : f32
    %32 = vector.broadcast %cst_10 : f32 to vector<2x32xf32>
    %33 = arith.addf %32, %31 : vector<2x32xf32>
    %cst_11 = arith.constant 5.000000e-01 : f32
    %34 = vector.broadcast %cst_11 : f32 to vector<2x32xf32>
    %35 = arith.mulf %34, %7 : vector<2x32xf32>
    %cst_12 = arith.constant -6.000000e+00 : f32
    %36 = vector.broadcast %cst_12 : f32 to vector<2x32xf32>
    %37 = arith.subf %35, %36 : vector<2x32xf32>
    %cst_13 = arith.constant 0.000000e+00 : f32
    %38 = vector.broadcast %cst_13 : f32 to vector<2x32xf32>
    %39 = arith.maximumf %37, %38 : vector<2x32xf32>
    %40 = math.absf %37 : vector<2x32xf32>
    %cst_14 = arith.constant 0.000000e+00 : f32
    %41 = vector.broadcast %cst_14 : f32 to vector<2x32xf32>
    %42 = arith.subf %41, %40 : vector<2x32xf32>
    %43 = math.exp %42 : vector<2x32xf32>
    %cst_15 = arith.constant 1.000000e+00 : f32
    %44 = vector.broadcast %cst_15 : f32 to vector<2x32xf32>
    %45 = arith.addf %44, %43 : vector<2x32xf32>
    %46 = math.log %45 : vector<2x32xf32>
    %47 = arith.addf %39, %46 : vector<2x32xf32>
    %cst_16 = arith.constant 2.000000e+01 : f32
    %48 = vector.broadcast %cst_16 : f32 to vector<2x32xf32>
    %49 = arith.cmpf ogt, %37, %48 : vector<2x32xf32>
    %50 = arith.select %49, %37, %47 : vector<2x32xi1>, vector<2x32xf32>
    %cst_17 = arith.constant -6.000000e+00 : f32
    %51 = vector.broadcast %cst_17 : f32 to vector<2x32xf32>
    %52 = arith.addf %51, %50 : vector<2x32xf32>
    %53 = arith.subf %33, %52 : vector<2x32xf32>
    %54 = arith.mulf %14, %14 : vector<2x32xf32>
    %55 = arith.addf %10, %54 : vector<2x32xf32>
    %cst_18 = arith.constant 5.000000e-01 : f32
    %56 = vector.broadcast %cst_18 : f32 to vector<2x32xf32>
    %57 = arith.mulf %56, %13 : vector<2x32xf32>
    %58 = arith.mulf %55, %57 : vector<2x32xf32>
    %59 = arith.subf %53, %58 : vector<2x32xf32>
    %cst_19 = arith.constant 5.000000e-01 : f32
    %60 = vector.broadcast %cst_19 : f32 to vector<2x32xf32>
    %61 = arith.addf %59, %60 : vector<2x32xf32>
    %cst_20 = arith.constant 0.000000e+00 : f32
    %62 = vector.broadcast %cst_20 : f32 to vector<2x32xf32>
    %63 = arith.subf %62, %61 : vector<2x32xf32>
    %cst_21 = arith.constant 2.000000e+00 : f32
    %64 = vector.broadcast %cst_21 : f32 to vector<2x32xf32>
    %65 = arith.addf %64, %7 : vector<2x32xf32>
    %66 = arith.addf %65, %8 : vector<2x32xf32>
    %67 = arith.mulf %5, %5 : vector<2x32xf32>
    %68 = arith.subf %66, %67 : vector<2x32xf32>
    %69 = arith.mulf %6, %6 : vector<2x32xf32>
    %70 = arith.subf %68, %69 : vector<2x32xf32>
    %71 = arith.subf %70, %9 : vector<2x32xf32>
    %72 = arith.subf %71, %10 : vector<2x32xf32>
    %cst_22 = arith.constant -2.500000e-01 : f32
    %73 = vector.broadcast %cst_22 : f32 to vector<2x32xf32>
    %74 = arith.mulf %73, %72 : vector<2x32xf32>
    %75 = arith.addf %63, %74 : vector<2x32xf32>
    %c0_23 = arith.constant 0 : index
    %c0_24 = arith.constant 0 : index
    %76 = vector.load %arg5[%c0_23, %c0_24] : memref<2x32xf32, #tpu.memory_space<vmem>>, vector<2x32xf32>
    %77 = arith.addf %76, %75 : vector<2x32xf32>
    %c0_25 = arith.constant 0 : index
    %c0_26 = arith.constant 0 : index
    %78 = vector.load %arg5[%c0_25, %c0_26] : memref<2x32xf32, #tpu.memory_space<vmem>>, vector<2x32xf32>
    tpu.vector_store %arg5[%c0_25, %c0_26], %77 {strides = array<i32>} : memref<2x32xf32, #tpu.memory_space<vmem>>, vector<2x32xf32>,
    %c0_i32_27 = arith.constant 0 : i32
    %79 = arith.cmpi eq, %arg1, %c0_i32_27 : i32
    %80 = arith.extui %79 : i1 to i32
    %c0_i32_28 = arith.constant 0 : i32
    %81 = arith.cmpi ne, %80, %c0_i32_28 : i32
    scf.if %81 {
      %cst_29 = arith.constant 0.000000e+00 : f32
      %82 = vector.broadcast %cst_29 : f32 to vector<1x8x128xf32>
      %c0_30 = arith.constant 0 : index
      %c0_31 = arith.constant 0 : index
      %83 = vector.load %arg5[%c0_30, %c0_31] : memref<2x32xf32, #tpu.memory_space<vmem>>, vector<2x32xf32>
      %84 = vector.shape_cast %83 : vector<2x32xf32> to vector<1x2x32xf32>
      %cst_32 = arith.constant dense<0.000000e+00> : vector<1xf32>
      %85 = vector.multi_reduction <add>, %84, %cst_32 [1, 2] : vector<1x2x32xf32> to vector<1xf32>
      %86 = vector.shape_cast %85 : vector<1xf32> to vector<1x1x1xf32>
      %87 = vector.extract %86[0, 0, 0] : f32 from vector<1x1x1xf32>
      %cst_33 = arith.constant 1.562500e-02 : f32
      %88 = arith.mulf %87, %cst_33 : f32
      %89 = vector.broadcast %88 : f32 to vector<1x8x128xf32>
      %90 = arith.addf %82, %89 : vector<1x8x128xf32>
      %c0_34 = arith.constant 0 : index
      %c0_35 = arith.constant 0 : index
      %c0_36 = arith.constant 0 : index
      %91 = vector.load %arg4[%c0_34, %c0_35, %c0_36] : memref<1x8x128xf32, #tpu.memory_space<vmem>>, vector<1x8x128xf32>
      tpu.vector_store %arg4[%c0_34, %c0_35, %c0_36], %90 {strides = array<i32>} : memref<1x8x128xf32, #tpu.memory_space<vmem>>, vector<1x8x128xf32>,
    } else {
    }
    return
  }
  func.func @transform_0(%arg0: i32, %arg1: i32) -> (i32, i32) {
    %c1_i32 = arith.constant 1 : i32
    %0 = arith.muli %arg0, %c1_i32 : i32
    %1 = arith.addi %0, %arg1 : i32
    %c0_i32 = arith.constant 0 : i32
    %2 = arith.minsi %1, %c0_i32 : i32
    %c0_i32_0 = arith.constant 0 : i32
    %c0_i32_1 = arith.constant 0 : i32
    return %2, %c0_i32_0 : i32, i32
  }
  func.func @transform_1(%arg0: i32, %arg1: i32) -> (i32, i32) {
    %c1_i32 = arith.constant 1 : i32
    %0 = arith.muli %arg0, %c1_i32 : i32
    %1 = arith.addi %0, %arg1 : i32
    %c0_i32 = arith.constant 0 : i32
    %2 = arith.minsi %1, %c0_i32 : i32
    %c0_i32_0 = arith.constant 0 : i32
    %c0_i32_1 = arith.constant 0 : i32
    return %2, %c0_i32_0 : i32, i32
  }
  func.func @transform_2(%arg0: i32, %arg1: i32) -> (i32, i32, i32) {
    %c0_i32 = arith.constant 0 : i32
    %c0_i32_0 = arith.constant 0 : i32
    %c0_i32_1 = arith.constant 0 : i32
    return %arg0, %c0_i32, %c0_i32_0 : i32, i32, i32
  }
}

</mosaic_0001>

<bundles_post_ra>
// kernel: tpu_custom_call.1
= control target key start
LH: loop header
LB: loop body
LE: loop exit
PB: predicated region body
PF: predicated region fallthrough
CT: control target
= control target key end

     0   :  { %7 = vsyncpa [#allocation4], 0  ;;  %s318_s0 = inlined_call_operand.hbm [shape: f32[2,64], index: 0, kind: input, shape index: {}]   ;;  %s319_s1 = inlined_call_operand.hbm [shape: f32[2,64], index: 1, kind: input, shape index: {}]   ;;  %s320_s2 = inlined_call_operand.hbm [shape: f32[1,8,128], index: 2, kind: output, shape index: {}]  }
   0x1   :  { %8 = vsyncpa [#allocation7], 0 }
   0x2   :  { %9 = vsyncpa [#allocation5], 0  ;;  %s20_s11 = sshll.u32 %s318_s0, 4  ;;  %s276_s12 = smov [#allocation3]   ;;  %s21_s11 = int_to_ptr.hbm [resolvable:$true] %s20_s11 }
   0x3   :  { %s22_s13 = sshll.u32 %s276_s12, 4  ;;  %s36_s16 = sshll.u32 %s319_s1, 4  ;;  %s23_s13 = int_to_ptr.vmem [resolvable:$true] %s22_s13  ;;  %s37_s16 = int_to_ptr.hbm [resolvable:$true] %s36_s16 }
   0x4   :  { %25 = dma.hbm_to_vmem [thread:$0]  %s21_s11, 32, %s23_s13, [#allocation4]  }
   0x5   :  { %s277_s17 = smov [#allocation6]  }
   0x6   :  { %s38_s18 = sshll.u32 %s277_s17, 4  ;;  %s39_s18 = int_to_ptr.vmem [resolvable:$true] %s38_s18 }
   0x7   :  { %41 = dma.hbm_to_vmem [thread:$0]  %s37_s16, 32, %s39_s18, [#allocation7]  }
   0x8   :  { %270 = dma.done.wait [#allocation4], 32  }
   0x9   :  { %271 = vsyncadd [#allocation4], 4294967264 }
   0xa   :  { %272 = dma.done.wait [#allocation7], 32  }
   0xb   :  { %273 = vsyncadd [#allocation7], 4294967264  ;;  %v62_v0 = vld [vmem:[#allocation3] sm:$0x3]  ;;  %v63_v1 = vld [vmem:[#allocation6] sm:$0x3] }
   0xc   :  { %s278_s0 = smov 96   ;;  %v64_v2 = vmul.f32 1.442695, %v63_v1  ;;  %v114_v3 = vmul.f32 %v62_v0, %v62_v0  ;;  %v66_v4 = vsub.f32 0.0, %v63_v1  ;;  %s279_s1 = smov 32   ;;  %v74_v9 = vmul.f32 0.5, %v63_v1 }
   0xd   :  { %70 = vrot.lane.b32.xlu0 %v62_v0, %s278_s0  ;;  %v108_v24 = vadd.f32 2.0, %v63_v1  ;;  %vm60_vm1 = vcmask 254976   ;;  %v280_v35 = vmov 0.0   ;;  %s281_s19 = smov [#allocation8]   ;;  %s166_s23 = sshll.u32 %s320_s2, 4  ;;  %s167_s23 = int_to_ptr.hbm [resolvable:$true] %s166_s23 }
   0xe   :  { %190 = vpow2.f32 %v64_v2  ;;  %117 = vrot.lane.b32.xlu1 %v114_v3, %s278_s0  ;;  %v67_v5 = vmul.f32 1.442695, %v66_v4  ;;  %v181_v10 = vadd.f32 6.0, %v74_v9  ;;  %61 = vst.msk [vmem:[#allocation2] sm:$0x3] %vm60_vm1, %v280_v35  ;;  %s164_s20 = sshll.u32 %s281_s19, 4  ;;  %s165_s20 = int_to_ptr.vmem [resolvable:$true] %s164_s20 }
  0x10   :  { %192 = vpow2.f32 %v67_v5  ;;  %v77_v11 = vand.u32 2147483647, %v181_v10  ;;  %v76_v17 = vmax.f32 %v181_v10, 0.0  ;;  %vm85_vm0 = vcmp.gt.f32.partialorder %v181_v10, 20.0 }
  0x12   :  { %v78_v12 = vsub.f32 0.0, %v77_v11 }
  0x14   :  { %v191_v6 = vpop.eup %190  ;;  %v79_v13 = vmul.f32 1.442695, %v78_v12 }
  0x15   :  { %110 = vrot.lane.b32.xlu0 %v63_v1, %s278_s0  ;;  %v133_v47 = vld [vmem:[#allocation2] sm:$0x3] }
  0x16   :  { %v193_v7 = vpop.eup %192  ;;  %123 = vrot.lane.b32.xlu1 %v191_v6, %s278_s0  ;;  %194 = vpow2.f32 %v79_v13 }
  0x17   :  { %v99_v8 = vmul.f32 0.5, %v193_v7 }
  0x1c   :  { %v195_v14 = vpop.eup %194 }
  0x1d   :  { %101 = vrot.lane.b32.xlu0 %v99_v8, %s279_s1  ;;  %v81_v15 = vadd.f32 1.0, %v195_v14 }
  0x1f   :  { %196 = vlog2.f32 %v81_v15 }
  0x25   :  { %v197_v16 = vpop.eup %196 }
  0x26   :  { %v83_v18 = vmul.f32 0.6931472, %v197_v16 }
  0x28   :  { %v84_v21 = vadd.f32 %v83_v18, %v76_v17 }
  0x2a   :  { %v86_v25 = vsel %vm85_vm0, %v181_v10, %v84_v21 }
  0x2b   :  { %v87_v28 = vadd.f32 -6.0, %v86_v25 }
  0x7f   :  { %v71_v19 = vpop.permute.xlu0 %70 }
  0x80   :  { %v73_v20 = vsub.f32 %v62_v0, %v71_v19  ;;  %v118_v23 = vpop.permute.xlu1 %117 }
  0x82   :  { %v93_v22 = vmul.f32 %v73_v20, %v73_v20 }
  0x84   :  { %95 = vrot.lane.b32.xlu2 %v93_v22, %s279_s1 }
  0x87   :  { %v111_v26 = vpop.permute.xlu0 %110 }
  0x88   :  { %v113_v27 = vadd.f32 %v111_v26, %v108_v24  ;;  %v124_v31 = vpop.permute.xlu1 %123 }
  0x8a   :  { %v115_v29 = vsub.f32 %v113_v27, %v114_v3 }
  0x8c   :  { %v120_v30 = vsub.f32 %v115_v29, %v118_v23  ;;  %89 = vrot.lane.b32.xlu2 %v87_v28, %s279_s1 }
  0x8e   :  { %v121_v32 = vsub.f32 %v120_v30, %v191_v6 }
  0x8f   :  { %v102_v39 = vpop.permute.xlu0 %101 }
  0x90   :  { %v126_v33 = vsub.f32 %v121_v32, %v124_v31 }
  0x92   :  { %v127_v34 = vmul.f32 -0.25, %v126_v33 }
  0x94   :  { %129 = vrot.lane.b32.xlu1 %v127_v34, %s279_s1 }
  0xde   :  { %v96_v36 = vpop.permute.xlu2 %95 }
  0xdf   :  { %v98_v38 = vadd.f32 %v191_v6, %v96_v36 }
  0xe1   :  { %v104_v41 = vmul.f32 %v102_v39, %v98_v38 }
  0xe6   :  { %v90_v37 = vpop.permute.xlu2 %89 }
  0xe7   :  { %v92_v40 = vsub.f32 %v87_v28, %v90_v37 }
  0xe9   :  { %v105_v42 = vsub.f32 %v92_v40, %v104_v41 }
  0xeb   :  { %v106_v43 = vadd.f32 0.5, %v105_v42 }
  0xed   :  { %v107_v44 = vsub.f32 0.0, %v106_v43 }
 0x106   :  { %v130_v45 = vpop.permute.xlu1 %129 }
 0x107   :  { %v132_v46 = vadd.f32 %v130_v45, %v107_v44 }
 0x109   :  { %135 = vrot.lane.b32.xlu2 %v132_v46, %s278_s0 }
 0x163   :  { %v136_v48 = vpop.permute.xlu2 %135 }
 0x164   :  { %v138_v49 = vadd.f32 %v136_v48, %v133_v47 }
 0x166   :  { %140 = vst.msk [vmem:[#allocation2] sm:$0x3] %vm60_vm1, %v138_v49 }
 0x16d   :  { %v144_v50 = vld [vmem:[#allocation2] sm:$0x3] }
 0x16e   :  { %v145_v51 = vsel %vm60_vm1, %v144_v50, 0.0 }
 0x16f   :  { %146 = vadd.xlane.f32.xlu0 %v145_v51 }
 0x1e2   :  { %v147_v52 = vpop.xlane.xlu0 %146 }
 0x1e3   :  { %v148_v53 = vrot.slane %v147_v52, 4 }
 0x1e5   :  { %v149_v54 = vadd.f32 %v148_v53, %v147_v52 }
 0x1e7   :  { %v150_v55 = vrot.slane %v149_v54, 2 }
 0x1e9   :  { %v151_v56 = vadd.f32 %v150_v55, %v149_v54 }
 0x1eb   :  { %v152_v57 = vrot.slane %v151_v56, 1 }
 0x1ed   :  { %v153_v58 = vadd.f32 %v152_v57, %v151_v56 }
 0x1ef   :  { %182 = vpush %v153_v58 }
 0x220   :  { %s183_s24 = spop %182 }
 0x221   :  { %s155_s25 = smul.f32 0.015625, %s183_s24 }
 0x223   :  { %v156_v59 = vstv %s155_s25 }
 0x224   :  { %158 = vst [vmem:[#allocation8] sm:$0xff] %v156_v59 }
 0x225   :  { %169 = dma.vmem_to_hbm [thread:$0]  %s165_s20, 128, %s167_s23, [#allocation5]  }
 0x226   :  { %274 = dma.done.wait [#allocation5], 128  }
 0x227   :  { %275 = vsyncadd [#allocation5], 4294967168 }
 0x228   :  { %174 = vsyncpa [#allocation4], 1 }
 0x229   :  { %175 = vsyncpa [#allocation7], 1 }
 0x22a   :  { %176 = vsyncpa [#allocation5], 1 }

</bundles_post_ra>
